<compile_context>
chip_gen: v5e
topology: v5e:2x2
jax: 0.10.0
libtpu: 0.0.40
codegen_flags: <defaults>
</compile_context>

<pallas_src>
import jax
import jax.numpy as jnp
from jax import lax
from jax.experimental import pallas as pl
from jax.experimental.pallas import tpu as pltpu

KSIZE = 31   # avg_pool2d kernel_size
PAD = 15     # avg_pool2d padding (count_include_pad=True -> divisor always 31*31)
_INV_K2 = 1.0 / float(KSIZE * KSIZE)


def _block_band_matrix(n, p):
    """(p*n, p*n) 0/1 bf16 block-diagonal band matrix: 1 where the two indices fall in
    the same n-wide block and |i%n - j%n| <= PAD. p=1 gives the plain band matrix."""
    m = p * n
    i = lax.broadcasted_iota(jnp.int32, (m, m), 0)
    j = lax.broadcasted_iota(jnp.int32, (m, m), 1)
    same_map = (i // n) == (j // n)
    band = jnp.abs((i % n) - (j % n)) <= PAD
    return (same_map & band).astype(jnp.bfloat16)


def _vmem_capacity_bytes():
    try:
        return int(pltpu.get_tpu_info().vmem_capacity_bytes)
    except Exception:
        return 64 * 1024 * 1024   # v7x per-TensorCore VMEM (smallest current gen)


def _vmem_estimate(p, h, w, pred_itemsize):
    pw = p * w
    blk_in = 2 * h * pw * pred_itemsize + 2 * h * pw * 2   # double-buffered pred + bf16 gt
    blk_out = 2 * 4 * pw * 4                                # double-buffered (4, P*W) f32 out
    bands = 2 * (h * h + pw * pw) * 2                       # band matrices (pipeline buffers)
    tmps = 10 * h * pw * 4                                  # in-kernel f32 temporaries (generous)
    return blk_in + blk_out + bands + tmps


def _choose_pack(nc, h, w, pred_itemsize, cap):
    """Lane-pack factor P (divisor of N*C): targets lane width P*W <= 256, keeps the
    grid >= 2 steps when N*C > 1 (v7x megacore), shrinks P if the VMEM estimate
    exceeds ~45% of device VMEM."""
    divisors = [p for p in range(1, nc + 1) if nc % p == 0]
    cands = [p for p in divisors
             if (p == 1 or p * w <= 256) and (nc == 1 or nc // p >= 2)]
    if not cands:
        cands = [1]
    budget = 0.45 * cap
    for p in sorted(cands, reverse=True):
        if _vmem_estimate(p, h, w, pred_itemsize) <= budget:
            return p
    return min(cands)


def _dfus_kernel(bh_ref, bw_ref, pred_ref, gt_ref, out_ref):
    # bh_ref: (H, H) bf16 band matrix; bw_ref: (P*W, P*W) bf16 block-diagonal band.
    # pred_ref: (1, H, P*W) block; gt_ref: (1, H, P*W) bf16 block (P maps packed along lanes).
    # out_ref: (1, 4, P*W) f32 -> per-lane row sums of [w, w*bce, p*gt*w, w*(p+gt)].
    gt_bf = gt_ref[0]                               # (H, PW) bf16, 0/1 exact
    pred = pred_ref[0].astype(jnp.float32)          # (H, PW)
    gt = gt_bf.astype(jnp.float32)

    # ---- avg_pool2d via two banded MXU matmuls (f32 accumulation, exact for 0/1 gt) ----
    rowsum = jnp.dot(bh_ref[...], gt_bf, preferred_element_type=jnp.float32)   # (H, PW)
    box = jnp.dot(rowsum.astype(jnp.bfloat16), bw_ref[...],
                  preferred_element_type=jnp.float32)                           # (H, PW)

    # ---- weights = 1 + 5 * |avgpool(gt) - gt| ----
    w = 1.0 + 5.0 * jnp.abs(box * _INV_K2 - gt)

    # ---- stable BCE-with-logits + sigmoid sharing e = exp(-|pred|); rcp on the EUP ----
    e = jnp.exp(-jnp.abs(pred))
    bce = jnp.maximum(pred, 0.0) - pred * gt + jnp.log1p(e)
    p = jnp.where(pred >= 0.0, 1.0, e) * pl.reciprocal(1.0 + e, approx=True)

    # ---- row-reduced (over H) weighted partial sums; one lane-dense vector store ----
    s_w = jnp.sum(w, axis=0, keepdims=True)
    s_wb = jnp.sum(w * bce, axis=0, keepdims=True)
    s_in = jnp.sum(p * gt * w, axis=0, keepdims=True)
    s_un = jnp.sum(w * (p + gt), axis=0, keepdims=True)     # fused union = p*w + gt*w
    out_ref[0] = jnp.concatenate([s_w, s_wb, s_in, s_un], axis=0)


def hardnet_dfus_loss(pred, gt):
    """Pallas implementation of HarDNetDFUSLoss.forward. pred/gt: (N, C, H, W)."""
    N, C, H, W = pred.shape
    NC = N * C

    cap = _vmem_capacity_bytes()
    P = _choose_pack(NC, H, W, pred.dtype.itemsize, cap)
    G = NC // P
    PW = P * W

    # Layout plumbing (wrapper side): lane-pack P maps per block -> (G, H, P*W).
    # gt is binary, so the bf16 cast is exact (soft masks would round at ~1e-3).
    pred_pk = pred.reshape(G, P, H, W).transpose(0, 2, 1, 3).reshape(G, H, PW)
    gt_pk = gt.astype(jnp.bfloat16).reshape(G, P, H, W).transpose(0, 2, 1, 3).reshape(G, H, PW)

    bh = _block_band_matrix(H, 1)     # (H, H) — fetched once per core (constant index map)
    bwd = _block_band_matrix(W, P)    # (P*W, P*W) block-diagonal band

    est = _vmem_estimate(P, H, W, pred.dtype.itemsize)
    vmem_limit = int(min(0.9 * cap, max(32 * 1024 * 1024, 2 * est)))

    sums = pl.pallas_call(
        _dfus_kernel,
        out_shape=jax.ShapeDtypeStruct((G, 4, PW), jnp.float32),
        grid_spec=pltpu.PrefetchScalarGridSpec(
            num_scalar_prefetch=0,
            grid=(G,),
            in_specs=[
                pl.BlockSpec((H, H), lambda i: (0, 0)),         # Bh (resident)
                pl.BlockSpec((PW, PW), lambda i: (0, 0)),       # block-diag Bw (resident)
                pl.BlockSpec((1, H, PW), lambda i: (i, 0, 0)),  # pred, packed
                pl.BlockSpec((1, H, PW), lambda i: (i, 0, 0)),  # gt, packed bf16
            ],
            out_specs=pl.BlockSpec((1, 4, PW), lambda i: (i, 0, 0)),
        ),
        compiler_params=pltpu.CompilerParams(
            dimension_semantics=("parallel",),   # shards the G blocks across v7x TCs
            vmem_limit_bytes=vmem_limit,
        ),
    )(bh, bwd, pred_pk, gt_pk)

    # Tiny epilogue in plain JAX: per-map (W-lane-group) reduction, ratios, mean.
    per_map = sums.reshape(G, 4, P, W).sum(axis=-1)             # (G, 4, P) — all N*C maps
    w_sum, swb, inter, union = (per_map[:, k] for k in range(4))
    wbce = swb / w_sum
    iou = 1.0 - (inter + 1.0) / (union - inter + 1.0)
    return jnp.mean(wbce) + jnp.mean(iou)


def _reference_loss(pred, gt):
    """Pure-JAX reference mirroring the PyTorch forward (for self-check)."""
    ksum = lax.reduce_window(
        gt, 0.0, lax.add,
        window_dimensions=(1, 1, KSIZE, KSIZE),
        window_strides=(1, 1, 1, 1),
        padding=[(0, 0), (0, 0), (PAD, PAD), (PAD, PAD)],
    )
    avg = ksum / float(KSIZE * KSIZE)
    w = 1.0 + 5.0 * jnp.abs(avg - gt)
    bce = jnp.maximum(pred, 0.0) - pred * gt + jnp.log1p(jnp.exp(-jnp.abs(pred)))
    wbce = (w * bce).sum(axis=(2, 3)) / w.sum(axis=(2, 3))
    p = jax.nn.sigmoid(pred)
    inter = (p * gt * w).sum(axis=(2, 3))
    union = (p * w).sum(axis=(2, 3)) + (gt * w).sum(axis=(2, 3))
    iou = 1.0 - (inter + 1.0) / (union - inter + 1.0)
    return wbce.mean() + iou.mean()


if __name__ == "__main__":
    key = jax.random.PRNGKey(0)
    k_pred, k_gt = jax.random.split(key)

    N, C, H, W = 2, 4, 16, 16
    pred = jax.random.normal(k_pred, (N, C, H, W), dtype=jnp.float32)
    gt = (jax.random.uniform(k_gt, (N, C, H, W)) > 0.5).astype(jnp.float32)

    loss = jax.block_until_ready(hardnet_dfus_loss(pred, gt))
    ref = jax.block_until_ready(_reference_loss(pred, gt))

    assert jnp.isfinite(loss), "loss is not finite"
    assert abs(float(loss) - float(ref)) < 3e-4, (float(loss), float(ref))
    print("KERNEL_OK")
</pallas_src>

<mosaic_0001>
module attributes {stable_mosaic.version = 11 : i64} {
  func.func @_dfus_kernel(%arg0: i32, %arg1: memref<16x16xbf16, #tpu.memory_space<vmem>>, %arg2: memref<64x64xbf16, #tpu.memory_space<vmem>>, %arg3: memref<1x16x64xf32, #tpu.memory_space<vmem>>, %arg4: memref<1x16x64xbf16, #tpu.memory_space<vmem>>, %arg5: memref<1x4x64xf32, #tpu.memory_space<vmem>>) attributes {dimension_semantics = [#tpu.dimension_semantics<parallel>], iteration_bounds = array<i64: 2>, scalar_prefetch = 0 : i64, scratch_operands = 0 : i64, tpu.core_type = #tpu.core_type<tc>, window_params = [{pipeline_mode = #tpu.pipeline_mode<synchronous>, transform_indices = @transform_0, window_bounds = array<i64: 16, 16>}, {pipeline_mode = #tpu.pipeline_mode<synchronous>, transform_indices = @transform_1, window_bounds = array<i64: 64, 64>}, {transform_indices = @transform_2, window_bounds = array<i64: 1, 16, 64>}, {transform_indices = @transform_3, window_bounds = array<i64: 1, 16, 64>}, {transform_indices = @transform_4, window_bounds = array<i64: 1, 4, 64>}]} {
    %c0 = arith.constant 0 : index
    %c0_0 = arith.constant 0 : index
    %c0_1 = arith.constant 0 : index
    %0 = vector.load %arg4[%c0, %c0_0, %c0_1] : memref<1x16x64xbf16, #tpu.memory_space<vmem>>, vector<1x16x64xbf16>
    %1 = vector.shape_cast %0 : vector<1x16x64xbf16> to vector<16x64xbf16>
    %c0_2 = arith.constant 0 : index
    %c0_3 = arith.constant 0 : index
    %c0_4 = arith.constant 0 : index
    %2 = vector.load %arg3[%c0_2, %c0_3, %c0_4] : memref<1x16x64xf32, #tpu.memory_space<vmem>>, vector<1x16x64xf32>
    %3 = vector.shape_cast %2 : vector<1x16x64xf32> to vector<16x64xf32>
    %4 = arith.extf %1 : vector<16x64xbf16> to vector<16x64xf32>
    %c0_5 = arith.constant 0 : index
    %c0_6 = arith.constant 0 : index
    %5 = vector.load %arg1[%c0_5, %c0_6] : memref<16x16xbf16, #tpu.memory_space<vmem>>, vector<16x16xbf16>
    %cst = arith.constant dense<0.000000e+00> : vector<16x64xf32>
    %6 = tpu.matmul %5, %1, %cst {dimension_numbers = #tpu.dot_dimension_numbers<[1], [0], [0], [1], [0, 0, 1, 1], [], []>} : vector<16x16xbf16>, vector<16x64xbf16>, vector<16x64xf32> -> vector<16x64xf32>
    %7 = arith.truncf %6 : vector<16x64xf32> to vector<16x64xbf16>
    %c0_7 = arith.constant 0 : index
    %c0_8 = arith.constant 0 : index
    %8 = vector.load %arg2[%c0_7, %c0_8] : memref<64x64xbf16, #tpu.memory_space<vmem>>, vector<64x64xbf16>
    %cst_9 = arith.constant dense<0.000000e+00> : vector<16x64xf32>
    %9 = tpu.matmul %7, %8, %cst_9 {dimension_numbers = #tpu.dot_dimension_numbers<[1], [0], [0], [1], [0, 0, 1, 1], [], []>} : vector<16x64xbf16>, vector<64x64xbf16>, vector<16x64xf32> -> vector<16x64xf32>
    %cst_10 = arith.constant 0.00104058278 : f32
    %10 = vector.broadcast %cst_10 : f32 to vector<16x64xf32>
    %11 = arith.mulf %9, %10 : vector<16x64xf32>
    %12 = arith.subf %11, %4 : vector<16x64xf32>
    %13 = math.absf %12 : vector<16x64xf32>
    %cst_11 = arith.constant 5.000000e+00 : f32
    %14 = vector.broadcast %cst_11 : f32 to vector<16x64xf32>
    %15 = arith.mulf %14, %13 : vector<16x64xf32>
    %cst_12 = arith.constant 1.000000e+00 : f32
    %16 = vector.broadcast %cst_12 : f32 to vector<16x64xf32>
    %17 = arith.addf %16, %15 : vector<16x64xf32>
    %18 = math.absf %3 : vector<16x64xf32>
    %cst_13 = arith.constant 0.000000e+00 : f32
    %19 = vector.broadcast %cst_13 : f32 to vector<16x64xf32>
    %20 = arith.subf %19, %18 : vector<16x64xf32>
    %21 = math.exp %20 : vector<16x64xf32>
    %cst_14 = arith.constant 0.000000e+00 : f32
    %22 = vector.broadcast %cst_14 : f32 to vector<16x64xf32>
    %23 = arith.maximumf %3, %22 : vector<16x64xf32>
    %24 = arith.mulf %3, %4 : vector<16x64xf32>
    %25 = arith.subf %23, %24 : vector<16x64xf32>
    %26 = math.log1p %21 : vector<16x64xf32>
    %27 = arith.addf %25, %26 : vector<16x64xf32>
    %cst_15 = arith.constant 0.000000e+00 : f32
    %28 = vector.broadcast %cst_15 : f32 to vector<16x64xf32>
    %29 = arith.cmpf oge, %3, %28 : vector<16x64xf32>
    %cst_16 = arith.constant 1.000000e+00 : f32
    %30 = vector.broadcast %cst_16 : f32 to vector<16x64xf32>
    %31 = arith.select %29, %30, %21 : vector<16x64xi1>, vector<16x64xf32>
    %cst_17 = arith.constant 1.000000e+00 : f32
    %32 = vector.broadcast %cst_17 : f32 to vector<16x64xf32>
    %33 = arith.addf %32, %21 : vector<16x64xf32>
    %34 = tpu.reciprocal %33 {approx = true} : vector<16x64xf32> -> vector<16x64xf32>
    %35 = arith.mulf %31, %34 : vector<16x64xf32>
    %cst_18 = arith.constant dense<0.000000e+00> : vector<64xf32>
    %36 = vector.multi_reduction <add>, %17, %cst_18 [0] : vector<16x64xf32> to vector<64xf32>
    %37 = vector.shape_cast %36 : vector<64xf32> to vector<1x64xf32>
    %38 = arith.mulf %17, %27 : vector<16x64xf32>
    %cst_19 = arith.constant dense<0.000000e+00> : vector<64xf32>
    %39 = vector.multi_reduction <add>, %38, %cst_19 [0] : vector<16x64xf32> to vector<64xf32>
    %40 = vector.shape_cast %39 : vector<64xf32> to vector<1x64xf32>
    %41 = arith.mulf %35, %4 : vector<16x64xf32>
    %42 = arith.mulf %41, %17 : vector<16x64xf32>
    %cst_20 = arith.constant dense<0.000000e+00> : vector<64xf32>
    %43 = vector.multi_reduction <add>, %42, %cst_20 [0] : vector<16x64xf32> to vector<64xf32>
    %44 = vector.shape_cast %43 : vector<64xf32> to vector<1x64xf32>
    %45 = arith.addf %35, %4 : vector<16x64xf32>
    %46 = arith.mulf %17, %45 : vector<16x64xf32>
    %cst_21 = arith.constant dense<0.000000e+00> : vector<64xf32>
    %47 = vector.multi_reduction <add>, %46, %cst_21 [0] : vector<16x64xf32> to vector<64xf32>
    %48 = vector.shape_cast %47 : vector<64xf32> to vector<1x64xf32>
    %49 = tpu.concatenate %37, %40, %44, %48 in 0 : vector<1x64xf32>, vector<1x64xf32>, vector<1x64xf32>, vector<1x64xf32> -> vector<4x64xf32>
    %c0_22 = arith.constant 0 : index
    %c0_23 = arith.constant 0 : index
    %c0_24 = arith.constant 0 : index
    %50 = vector.load %arg5[%c0_22, %c0_23, %c0_24] : memref<1x4x64xf32, #tpu.memory_space<vmem>>, vector<1x4x64xf32>
    %51 = vector.shape_cast %50 : vector<1x4x64xf32> to vector<4x64xf32>
    %52 = vector.shape_cast %49 : vector<4x64xf32> to vector<1x4x64xf32>
    tpu.vector_store %arg5[%c0_22, %c0_23, %c0_24], %52 {strides = array<i32>} : memref<1x4x64xf32, #tpu.memory_space<vmem>>, vector<1x4x64xf32>,
    return
  }
  func.func @transform_0(%arg0: i32) -> (i32, i32) {
    %c0_i32 = arith.constant 0 : i32
    %c0_i32_0 = arith.constant 0 : i32
    %c0_i32_1 = arith.constant 0 : i32
    return %c0_i32, %c0_i32_0 : i32, i32
  }
  func.func @transform_1(%arg0: i32) -> (i32, i32) {
    %c0_i32 = arith.constant 0 : i32
    %c0_i32_0 = arith.constant 0 : i32
    %c0_i32_1 = arith.constant 0 : i32
    return %c0_i32, %c0_i32_0 : i32, i32
  }
  func.func @transform_2(%arg0: i32) -> (i32, i32, i32) {
    %c0_i32 = arith.constant 0 : i32
    %c0_i32_0 = arith.constant 0 : i32
    %c0_i32_1 = arith.constant 0 : i32
    return %arg0, %c0_i32, %c0_i32_0 : i32, i32, i32
  }
  func.func @transform_3(%arg0: i32) -> (i32, i32, i32) {
    %c0_i32 = arith.constant 0 : i32
    %c0_i32_0 = arith.constant 0 : i32
    %c0_i32_1 = arith.constant 0 : i32
    return %arg0, %c0_i32, %c0_i32_0 : i32, i32, i32
  }
  func.func @transform_4(%arg0: i32) -> (i32, i32, i32) {
    %c0_i32 = arith.constant 0 : i32
    %c0_i32_0 = arith.constant 0 : i32
    %c0_i32_1 = arith.constant 0 : i32
    return %arg0, %c0_i32, %c0_i32_0 : i32, i32, i32
  }
}

</mosaic_0001>

<bundles_post_ra>
// kernel: tpu_custom_call.1
= control target key start
LH: loop header
LB: loop body
LE: loop exit
PB: predicated region body
PF: predicated region fallthrough
CT: control target
= control target key end

     0   :  { %s1192_s0 = inlined_call_operand.hbm [shape: bf16[16,16], index: 0, kind: input, shape index: {}]   ;;  %s1193_s1 = inlined_call_operand.hbm [shape: bf16[64,64], index: 1, kind: input, shape index: {}]   ;;  %s1194_s2 = inlined_call_operand.hbm [shape: f32[2,16,64], index: 2, kind: input, shape index: {}]   ;;  %s1195_s3 = inlined_call_operand.hbm [shape: bf16[2,16,64], index: 3, kind: input, shape index: {}]   ;;  %s1196_s4 = inlined_call_operand.hbm [shape: f32[2,4,64], index: 4, kind: output, shape index: {}]  }
   0x1   :  { %1205 = sst [smem:[#allocation16_spill]] %s1192_s0 }
   0x2   :  { %1206 = sst [smem:[#allocation17_spill]] %s1193_s1 }
   0x3   :  { %1207 = sst [smem:[#allocation18_spill]] %s1194_s2 }
   0x4   :  { %9 = vsyncpa [#allocation3], 0 }
   0x5   :  { %10 = vsyncpa [#allocation6], 0 }
   0x6   :  { %11 = vsyncpa [#allocation4], 0 }
   0x7   :  { %13 = vsyncpa [#allocation4 + $0x1], 0  ;;  %s980_s15 = smov 0   ;;  %s982_s16 = smov 0  }
   0x8   :  { %s984_s17 = smov 0   ;;  %s986_s18 = smov 0  }
   0x9 LB: > { %s1001_s19 = sadd.s32 4294967295, %s947_s18   ;;  %s610_s20 = sadd.s32 4294967294, %s947_s18   ;;  %s947_s18 = sphi %s986_s18, %s1229_s18   ;;  %s943_s17 = sphi %s984_s17, %s1233_s17   ;;  %s939_s16 = sphi %s982_s16, %s1232_s16   ;;  %s935_s15 = sphi %s980_s15, %s1231_s15  }
   0xa   : > { %p81_p0 = scmp.ne.s32.totalorder %s939_s16, %s935_s15  ;;  %p1202_p1 = scmp.eq.s32.totalorder %s1001_s19, 0 }
   0xb   : > { %p131_p2 = scmp.eq.s32.totalorder %s1001_s19, 1  ;;  %p137_p3 = scmp.eq.s32.totalorder %s610_s20, 1 }
   0xc   : > { %p1010_p4 = por %p1202_p1, %p81_p0  ;;  %p611_p5 = scmp.ge.s32.totalorder %s947_s18, 1 }
   0xd   : > { %p1015_p6 = por %p137_p3, %p81_p0  ;;  %p144_p7 = scmp.lt.s32.totalorder %s947_s18, 3 }
   0xe   : > { %s1210_s0 = sld [smem:[#allocation16_spill]]  ;;  %s949_s27 = smov [#allocation2]  }
   0xf   : > { %p1023_p8 = pnand %p611_p5, %p144_p7  ;;  %s157_s28 = sshll.u32 %s949_s27, 4  ;;  %s158_s28 = int_to_ptr.vmem [resolvable:$true] %s157_s28 }
  0x10   : > { %s1037_s30 = sadd.s32 1, %s947_s18   ;;  %s1197_s5 = smov 64  }
  0x11   : > { %p679_p9 = pneg %p1023_p8  ;;  %1213 = sst [smem:[#allocation14_spill]] %s1037_s30 }
  0x12   : > { %s1199_s6 = smov 4   ;;  %s65_s7 = ssub.s32 %s947_s18, %s1037_s30 }
  0x13   : > { %p1031_p10 = pnand %p679_p9, %p1202_p1  ;;  %s68_s8 = sadd.s32 1, %s943_s17 }
  0x14   : > { %s155_s25 = sshll.u32 %s1210_s0, 4  ;;  %p66_p12 = scmp.eq.s32.totalorder %s65_s7, 0  ;;  %s156_s25 = int_to_ptr.hbm [resolvable:$true] %s155_s25 }
  0x15   : > { %682 = dma.hbm_to_vmem [thread:$0]  (!%p1031_p10), %s156_s25, 128, %s158_s28, [#allocation3], %s1197_s5, %s1197_s5, %s1199_s6  }
  0x16   : > { %p75_p13 = scmp.ne.s32.totalorder %s943_s17, %s939_s16  ;;  %p76_p0 = scmp.eq.s32.totalorder %s947_s18, 0 }
  0x17   : > { %p699_p3 = scmp.lt.s32.totalorder %s947_s18, 2  ;;  %s185_s11 = sand.u32 1, %s947_s18  }
  0x18   : > { %s1052_s9 = scalar_select %p66_p12, %s943_s17, %s68_s8  }
  0x19   : > { %p77_p5 = por %p76_p0, %p75_p13  ;;  %p1056_p7 = por %p131_p2, %p75_p13 }
  0x1a   : > { %1214 = sst [smem:[#allocation15_spill]] %s1052_s9  ;;  %s1201_s12 = sand.u32 1, %s943_s17  }
  0x1b   : > { %s615_s13 = sshll.u32 %s1201_s12, 4  ;;  %s657_s14 = sshll.u32 %s947_s18, 4 }
  0x1c   : > { %s1216_s2 = sld [smem:[#allocation18_spill]]  ;;  %s189_s25 = scalar_lea.vmem [#allocation7], %s615_s13 }
  0x1d   : > { %s197_s27 = sshll.u32 %s189_s25, 4  ;;  %p1070_p9 = pnand %p699_p3, %p77_p5  ;;  %s198_s27 = int_to_ptr.vmem [resolvable:$true] %s197_s27 }
  0x1e   : > { %s1218_s1 = sld [smem:[#allocation17_spill]]  ;;  %s1077_s12 = scalar_lea.sflag [#allocation3], %s185_s11 }
  0x1f   : > { %p787_p12 = pneg %p1070_p9 }
  0x22   : > { %s194_s24 = scalar_lea.hbm %s1216_s2, %s657_s14 }
  0x23   : > { %s195_s28 = sshll.u32 %s194_s24, 4  ;;  %s790_s24 = scalar_lea.hbm %s1216_s2, 32  ;;  %s196_s28 = int_to_ptr.hbm [resolvable:$true] %s195_s28 }
  0x24   : > { %s169_s6 = sshll.u32 %s1218_s1, 4  ;;  %s783_s20 = sshra.s32 %s196_s28, 4  ;;  %s784_s20 = int_to_ptr.hbm [resolvable:$true] %s783_s20  ;;  %s170_s6 = int_to_ptr.hbm [resolvable:$true] %s169_s6 }
  0x25   : > { %s785_s13 = scalar_lea.hbm %s784_s20, 16  ;;  %p791_p3 = scmp.lt.s32.totalorder %s784_s20, %s1216_s2 }
  0x26   : > { %p786_p2 = scmp.ne.s32.totalorder %s784_s20, %s785_s13  ;;  %p792_p5 = scmp.lt.s32.totalorder %s790_s24, %s785_s13 }
  0x28   : > { %p788_p13 = pnand %p787_p12, %p786_p2  ;;  %p793_p11 = por %p792_p5, %p791_p3 }
  0x2a   : > { %p789_p0 = pneg %p788_p13 }
  0x2c   : > { %p794_p1 = pnand %p793_p11, %p789_p0 }
  0x2e   : > { %797 = shalt.err (!%p794_p1)
}
  0x2f   : > { %s952_s11 = smov 128   ;;  %s953_s8 = smov 8  }
  0x30   : > { %689 = dma.hbm_to_vmem [thread:$0]  (!%p1070_p9), %s196_s28, 256, %s198_s27, %s1077_s12, %s952_s11, %s952_s11, %s953_s8  }
  0x31   : > { %s954_s14 = smov [#allocation5]   ;;  %s1219_s0 = sand.u32 1, %s943_s17  }
  0x32   : > { %s171_s23 = sshll.u32 %s954_s14, 4  ;;  %s618_s5 = sshll.u32 %s1219_s0, 3  ;;  %s172_s23 = int_to_ptr.vmem [resolvable:$true] %s171_s23 }
  0x33   : > { %s1220_s20 = smov 4   ;;  %s1221_s13 = smov 64  }
  0x34   : > { %685 = dma.hbm_to_vmem [thread:$0]  (!%p1031_p10), %s170_s6, 512, %s172_s23, [#allocation6], %s1221_s13, %s1221_s13, %s1220_s20  }
  0x35   : > { %s658_s24 = sshll.u32 %s947_s18, 3  ;;  %s211_s25 = scalar_lea.vmem [#allocation8], %s618_s5 }
  0x36   : > { %s219_s1 = sshll.u32 %s211_s25, 4  ;;  %s216_s30 = scalar_lea.hbm %s1195_s3, %s658_s24  ;;  %s220_s1 = int_to_ptr.vmem [resolvable:$true] %s219_s1 }
  0x37   : > { %s217_s27 = sshll.u32 %s216_s30, 4  ;;  %s850_s6 = scalar_lea.hbm %s1195_s3, 16  ;;  %s218_s27 = int_to_ptr.hbm [resolvable:$true] %s217_s27 }
  0x38   : > { %s843_s28 = sshra.s32 %s218_s27, 4  ;;  %s844_s28 = int_to_ptr.hbm [resolvable:$true] %s843_s28 }
  0x39   : > { %s845_s11 = scalar_lea.hbm %s844_s28, 8  ;;  %p851_p10 = scmp.lt.s32.totalorder %s844_s28, %s1195_s3 }
  0x3a   : > { %p846_p1 = scmp.ne.s32.totalorder %s844_s28, %s845_s11  ;;  %p852_p13 = scmp.lt.s32.totalorder %s850_s6, %s845_s11 }
  0x3c   : > { %p848_p11 = pnand %p846_p1, %p787_p12  ;;  %p853_p0 = por %p852_p13, %p851_p10 }
  0x3e   : > { %p849_p2 = pneg %p848_p11 }
  0x40   : > { %p854_p3 = pnand %p853_p0, %p849_p2 }
  0x42   : > { %857 = shalt.err (!%p854_p3)
}
  0x43   : > { %692 = dma.hbm_to_vmem [thread:$0]  (!%p1070_p9), %s218_s27, 128, %s220_s1, %s1077_s12, %s1221_s13, %s1221_s13, %s1220_s20  }
  0x44   : > { %231 = sbr.rel (%p1023_p8) target bundleno = 391 (0x187), region = 36  ;;  %p1222_p12 = scmp.eq.s32.totalorder (!%p1023_p8), %s1001_s19, 0 }
  0x49   : > { %918 = dma.done.wait (%p1222_p12), [#allocation3], 128   ;;  %p1223_p5 = pmov %p1222_p12 }
  0x4b   : > { %920 = vsyncadd (%p1223_p5), [#allocation3], 4294967168  ;;  %p1224_p1 = pmov %p1223_p5 }
  0x4d   : > { %922 = dma.done.wait (%p1224_p1), [#allocation6], 512   ;;  %p1225_p11 = pmov %p1224_p1 }
  0x4e   : > { %s243_s2 = sand.u32 1, %s1001_s19   ;;  %s1131_s1 = sand.u32 1, %s939_s16  }
  0x4f   : > { %924 = vsyncadd (%p1225_p11), [#allocation6], 4294966784  ;;  %s624_s26 = sshll.u32 %s1131_s1, 4  ;;  %s244_s30 = scalar_lea.sflag [#allocation3], %s243_s2 }
  0x50   : > { %s247_s9 = scalar_lea.vmem [#allocation7], %s624_s26 }
  0x51   : > { %926 = dma.done.wait (%p1010_p4), %s244_s30, 384  }
  0x52   : > { %928 = vsyncadd (%p1010_p4), %s244_s30, 4294966912  ;;  %s625_s12 = sshll.u32 %s1131_s1, 3  ;;  %v660_v1 = vld [vmem:[#allocation2] sm:$0xff]  ;;  %vm308_vm0 = vcmask 130048   ;;  %v663_v3 = vld [vmem:[#allocation5 + $0x10] sm:$0xff]  ;;  %vm359_vm1 = vcmask 523264  }
  0x53   : > { %s1139_s7 = scalar_lea.vmem [#allocation8], %s625_s12  ;;  %v664_v2 = vld [vmem:[#allocation5 + $0x18] sm:$0xff]  ;;  %v662_v4 = vld [vmem:[#allocation5 + $0x8] sm:$0xff]  ;;  %v661_v5 = vld [vmem:[#allocation5] sm:$0xff]  ;;  %s626_s21 = sshll.u32 %s1131_s1, 2  ;;  %vm477_vm6 = vcmask 1040384  }
  0x54   : > { %v659_v0 = vld [vmem:[%s1139_s7] sm:$0xff]  ;;  %367 = vmatpush.bf16.msra.mxu1 %v664_v2  ;;  %v292_v11 = vld [vmem:[%s247_s9 + $0x8] sm:$0xff]  ;;  %s654_s23 = sshll.u32 %s1001_s19, 2  ;;  %vm479_vm7 = vcmask 1041408   ;;  %s287_s24 = scalar_lea.vmem [#allocation9], %s626_s21  ;;  %vm481_vm8 = vcmask 1042432  }
  0x55   : > { %319 = vmatpush.bf16.msra.mxu0 %v659_v0  ;;  %v291_v9 = vld [vmem:[%s247_s9] sm:$0xff]  ;;  %v388_v12 = vand.u32 2147483647, %v292_v11  ;;  %vm422_vm3 = vcmp.ge.f32.partialorder %v292_v11, 0.0  ;;  %v396_v46 = vmax.f32 %v292_v11, 0.0  ;;  %s496_s13 = scalar_lea.hbm %s1196_s4, %s654_s23  ;;  %s498_s25 = sshll.u32 %s287_s24, 4  ;;  %s499_s25 = int_to_ptr.vmem [resolvable:$true] %s498_s25 }
  0x56   : > { %v387_v10 = vand.u32 2147483647, %v291_v9  ;;  %v289_v20 = vld [vmem:[%s1139_s7] sm:$0xff]   ;;  %vm421_vm2 = vcmp.ge.f32.partialorder %v291_v9, 0.0  ;;  %v395_v31 = vmax.f32 %v291_v9, 0.0  ;;  %s500_s19 = sshll.u32 %s496_s13, 4  ;;  %s501_s19 = int_to_ptr.hbm [resolvable:$true] %s500_s19 }
  0x57   : > { %v390_v14 = vsub.f32 0.0, %v388_v12  ;;  %v293_v23 = vunpack.c.l.bf16 %v289_v20  ;;  %v294_v35 = vunpack.c.h.bf16 %v289_v20  ;;  %vm483_vm9 = vcmask 519168   ;;  %s486_s27 = scalar_lea.sflag [#allocation4], %s1131_s1  ;;  %s887_s28 = sshra.s32 %s501_s19, 4  ;;  %s888_s28 = int_to_ptr.hbm [resolvable:$true] %s887_s28 }
  0x58   : > { %635 = vmatmul.msk.bf16.vlgmr.msra.gmra.mxu0 %vm308_vm0, %v660_v1  ;;  %368 = vmatpush.bf16.msra.mxu1 %v663_v3  ;;  %v389_v13 = vsub.f32 0.0, %v387_v10  ;;  %s889_s11 = scalar_lea.hbm %s888_s28, 4  ;;  %s893_s6 = scalar_lea.hbm %s1196_s4, 8 }
  0x59   : > { %v393_v16 = vmul.f32 1.442695, %v390_v14  ;;  %v397_v27 = vmul.f32 %v293_v23, %v291_v9  ;;  %v398_v47 = vmul.f32 %v294_v35, %v292_v11  ;;  %p890_p4 = scmp.ne.s32.totalorder %s888_s28, %s889_s11  ;;  %p894_p2 = scmp.lt.s32.totalorder %s888_s28, %s1196_s4 }
  0x5a   : > { %v391_v15 = vmul.f32 1.442695, %v389_v13  ;;  %p895_p10 = scmp.lt.s32.totalorder %s893_s6, %s889_s11 }
  0x5b   : > { %v399_v42 = vsub.f32 %v395_v31, %v397_v27  ;;  %v400_v56 = vsub.f32 %v396_v46, %v398_v47  ;;  %p891_p8 = pnand %p890_p4, %p1056_p7 }
  0x5c   : > { %369 = vmatpush.bf16.msra.mxu1 %v662_v4  ;;  %741 = vpow2.f32 %v391_v15  ;;  %p896_p13 = por %p895_p10, %p894_p2 }
  0x5d   : > { %743 = vpow2.f32 %v393_v16  ;;  %p892_p9 = pneg %p891_p8 }
  0x5f   : > { %p897_p0 = pnand %p896_p13, %p892_p9 }
  0x60   : > { %370 = vmatpush.bf16.msra.mxu1 %v661_v5 }
  0x62   : > { %v742_v17 = vpop.eup %741 }
  0x63   : > { %v744_v18 = vpop.eup %743  ;;  %v401_v19 = vadd.f32 1.0, %v742_v17  ;;  %v404_v22 = vmul.f32 -0.5, %v742_v17  ;;  %v407_v32 = vand.u32 2147483647, %v742_v17  ;;  %v423_v37 = vsel %vm421_vm2, 1.0, %v742_v17 }
  0x64   : > { %v410_v21 = vadd.f32 1.0, %v744_v18  ;;  %v413_v25 = vmul.f32 -0.5, %v744_v18  ;;  %v416_v41 = vand.u32 2147483647, %v744_v18  ;;  %v424_v53 = vsel %vm422_vm3, 1.0, %v744_v18 }
  0x65   : > { %745 = vlog2.f32 %v401_v19  ;;  %v405_v28 = vadd.f32 1.0, %v404_v22  ;;  %vm1144_vm4 = vcmp.lt.f32.partialorder %v407_v32, 0.0004427343 }
  0x66   : > { %747 = vrcp.f32 %v401_v19  ;;  %v414_v33 = vadd.f32 1.0, %v413_v25  ;;  %vm417_vm5 = vcmp.lt.f32.partialorder %v416_v41, 0.0004427343 }
  0x67   : > { %749 = vlog2.f32 %v410_v21  ;;  %v406_v40 = vmul.f32 %v742_v17, %v405_v28 }
  0x68   : > { %751 = vrcp.f32 %v410_v21  ;;  %v415_v48 = vmul.f32 %v744_v18, %v414_v33 }
  0x6b   : > { %v746_v29 = vpop.eup %745 }
  0x6c   : > { %v748_v34 = vpop.eup %747  ;;  %v403_v39 = vmul.f32 0.6931472, %v746_v29 }
  0x6d   : > { %v750_v38 = vpop.eup %749  ;;  %v429_v44 = vmul.f32 %v748_v34, %v423_v37 }
  0x6e   : > { %v752_v49 = vpop.eup %751  ;;  %v412_v52 = vmul.f32 0.6931472, %v750_v38  ;;  %v409_v54 = vsel %vm1144_vm4, %v406_v40, %v403_v39 }
  0x6f   : > { %v430_v57 = vmul.f32 %v752_v49, %v424_v53  ;;  %v419_v59 = vadd.f32 %v409_v54, %v399_v42  ;;  %v451_v60 = vmul.f32 %v429_v44, %v293_v23  ;;  %v464_v62 = vadd.f32 %v429_v44, %v293_v23 }
  0x70   : > { %v418_v61 = vsel %vm417_vm5, %v415_v48, %v412_v52 }
  0x71   : > { %v420_v1 = vadd.f32 %v418_v61, %v400_v56  ;;  %v452_v2 = vmul.f32 %v430_v57, %v294_v35  ;;  %v465_v3 = vadd.f32 %v430_v57, %v294_v35 }
  0xd5   : > { %v321_v6 = vpop.f32.mrf.mxu0 }
  0xdd   : > { %v323_v7 = vpop.f32.mrf.mxu0 }
  0xde   : > { %v326_v8 = vpack.c.bf16 %v323_v7, %v321_v6 }
  0xe0   : > { %652 = vmatmul.msk.bf16.vlgmr.msra.gmra.mxu1 %vm359_vm1, %v326_v8 }
 0x15d   : > { %v372_v24 = vpop.f32.mrf.mxu1 }
 0x15e   : > { %v377_v26 = vmul.f32 0.0010405828, %v372_v24 }
 0x160   : > { %v379_v30 = vsub.f32 %v377_v26, %v293_v23 }
 0x162   : > { %v381_v36 = vand.u32 2147483647, %v379_v30 }
 0x164   : > { %v383_v50 = vmul.f32 5.0, %v381_v36 }
 0x165   : > { %v374_v45 = vpop.f32.mrf.mxu1 }
 0x166   : > { %v378_v51 = vmul.f32 0.0010405828, %v374_v45  ;;  %v385_v58 = vadd.f32 1.0, %v383_v50 }
 0x168   : > { %v380_v55 = vsub.f32 %v378_v51, %v294_v35  ;;  %v440_v4 = vmul.f32 %v419_v59, %v385_v58  ;;  %v453_v5 = vmul.f32 %v451_v60, %v385_v58  ;;  %v466_v6 = vmul.f32 %v464_v62, %v385_v58 }
 0x169   : > { %v431_v8 = vsel %vm359_vm1, %v385_v58, 0.0 }
 0x16a   : > { %v382_v63 = vand.u32 2147483647, %v380_v55  ;;  %v442_v13 = vsel %vm359_vm1, %v440_v4, 0.0  ;;  %v455_v14 = vsel %vm359_vm1, %v453_v5, 0.0  ;;  %v468_v16 = vsel %vm359_vm1, %v466_v6, 0.0 }
 0x16c   : > { %v384_v0 = vmul.f32 5.0, %v382_v63 }
 0x16e   : > { %v386_v7 = vadd.f32 1.0, %v384_v0 }
 0x170   : > { %v432_v9 = vsel %vm359_vm1, %v386_v7, 0.0  ;;  %v441_v10 = vmul.f32 %v420_v1, %v386_v7  ;;  %v454_v11 = vmul.f32 %v452_v2, %v386_v7  ;;  %v467_v12 = vmul.f32 %v465_v3, %v386_v7 }
 0x171   : > { %v433_v15 = vadd.f32 %v432_v9, %v431_v8 }
 0x172   : > { %v443_v17 = vsel %vm359_vm1, %v441_v10, 0.0  ;;  %v456_v18 = vsel %vm359_vm1, %v454_v11, 0.0  ;;  %v469_v19 = vsel %vm359_vm1, %v467_v12, 0.0 }
 0x173   : > { %v434_v20 = vrot.slane %v433_v15, 4  ;;  %v444_v21 = vadd.f32 %v443_v17, %v442_v13  ;;  %v457_v22 = vadd.f32 %v456_v18, %v455_v14  ;;  %v470_v23 = vadd.f32 %v469_v19, %v468_v16 }
 0x175   : > { %v435_v24 = vadd.f32 %v434_v20, %v433_v15  ;;  %v445_v25 = vrot.slane %v444_v21, 4  ;;  %v458_v26 = vrot.slane %v457_v22, 4  ;;  %v471_v27 = vrot.slane %v470_v23, 4 }
 0x177   : > { %v436_v28 = vrot.slane %v435_v24, 2  ;;  %v446_v29 = vadd.f32 %v445_v25, %v444_v21  ;;  %v459_v30 = vadd.f32 %v458_v26, %v457_v22  ;;  %v472_v31 = vadd.f32 %v471_v27, %v470_v23 }
 0x179   : > { %v437_v32 = vadd.f32 %v436_v28, %v435_v24  ;;  %v447_v33 = vrot.slane %v446_v29, 2  ;;  %v460_v34 = vrot.slane %v459_v30, 2  ;;  %v473_v35 = vrot.slane %v472_v31, 2 }
 0x17b   : > { %v438_v36 = vrot.slane %v437_v32, 1  ;;  %v448_v37 = vadd.f32 %v447_v33, %v446_v29  ;;  %v461_v38 = vadd.f32 %v460_v34, %v459_v30  ;;  %v474_v39 = vadd.f32 %v473_v35, %v472_v31 }
 0x17d   : > { %v449_v40 = vrot.slane %v448_v37, 1  ;;  %v462_v41 = vrot.slane %v461_v38, 1  ;;  %v475_v42 = vrot.slane %v474_v39, 1  ;;  %v439_v43 = vadd.f32 %v438_v36, %v437_v32 }
 0x17f   : > { %v450_v44 = vadd.f32 %v449_v40, %v448_v37  ;;  %v463_v45 = vadd.f32 %v462_v41, %v461_v38  ;;  %v476_v46 = vadd.f32 %v475_v42, %v474_v39 }
 0x181   : > { %v478_v47 = vsel %vm477_vm6, %v439_v43, %v450_v44 }
 0x182   : > { %v480_v48 = vsel %vm479_vm7, %v478_v47, %v463_v45 }
 0x183   : > { %v482_v49 = vsel %vm481_vm8, %v480_v48, %v476_v46 }
 0x184   : > { %484 = vst.msk [vmem:[%s287_s24] sm:$0xf] %vm483_vm9, %v482_v49 }
 0x185   : > { %900 = shalt.err (!%p897_p0)
}
 0x186   : > { %677 = dma.vmem_to_hbm [thread:$0]  (%p1056_p7), %s499_s25, 64, %s501_s19, %s486_s27  }
 0x187 PF: > { %s512_s2 = sand.u32 1, %s935_s15   ;;  %p1228_p3 = scmp.ge.s32.totalorder %s947_s18, 2 }
 0x188   : > { %s513_s1 = scalar_lea.sflag [#allocation4], %s512_s2 }
 0x189   : > { %p694_p12 = pnand %p1228_p3, %p1015_p6 }
 0x18b   : > { %p695_p5 = pneg %p694_p12 }
 0x18d   : > { %930 = dma.done.wait (%p695_p5), %s513_s1, 64  }
 0x18e   : > { %932 = vsyncadd (%p695_p5), %s513_s1, 4294967232  ;;  %s1229_s18 = sld [smem:[#allocation14_spill]]  ;;  %s1231_s15 = smov %s939_s16 }
 0x18f   : > { %s1230_s26 = sld [smem:[#allocation15_spill]]  ;;  %s1232_s16 = smov %s943_s17 }
 0x194   : > { %p16_p1 = scmp.ge.s32.totalorder %s1229_s18, 4  }
 0x195   : > { %s1233_s17 = smov %s1230_s26 }
 0x196   :  { %18 = sbr.rel (!%p16_p1) target bundleno = 9 (0x9), region = 99 }
 0x19b   :  { %519 = vsyncpa [#allocation3], 1 }
 0x19c   :  { %521 = vsyncpa [#allocation3 + $0x1], 1 }
 0x19d   :  { %522 = vsyncpa [#allocation6], 1 }
 0x19e   :  { %523 = vsyncpa [#allocation4], 1 }
 0x19f   :  { %525 = vsyncpa [#allocation4 + $0x1], 1 }

</bundles_post_ra>
